<compile_context>
chip_gen: v5e
topology: v5e:2x2
jax: 0.10.0
libtpu: 0.0.40
codegen_flags: <defaults>
</compile_context>

<pallas_src>
import functools

import jax
import jax.numpy as jnp
from jax.experimental import pallas as pl
from jax.experimental.pallas import tpu as pltpu


_LANE = 128     # fused output-lane padding (E*F=96 -> 128): lane-dense stores
_TM_MAX = 256   # batch tile once B is large (fills v6e/v7x MXU rows)
_TK_MAX = 8192  # D tile: bf16 weight block <= 2 MiB/buffer -> safe on v7x VMEM


def _ensemble_fused_kernel(x_ref, w_ref, b_ref, o_ref, acc_ref):
    # x_ref:   (TM, TK)    bf16  -- input tile, shared by all extractors
    # w_ref:   (TK, Npad)  bf16  -- all E extractor weights fused on lane axis
    # b_ref:   (1, Npad)   f32   -- fused biases
    # o_ref:   (TM, Npad)  f32   -- fused output slab (lane-dense)
    # acc_ref: (TM, Npad)  f32   -- VMEM accumulator across the K axis
    k = pl.program_id(1)

    @pl.when(k == 0)
    def _init():
        acc_ref[...] = jnp.zeros_like(acc_ref)

    acc_ref[...] += jnp.dot(x_ref[...], w_ref[...],
                            preferred_element_type=jnp.float32)

    @pl.when(k == pl.num_programs(1) - 1)
    def _finalize():
        o_ref[...] = (acc_ref[...] + b_ref[...]).astype(o_ref.dtype)


def prepare_fused_params(weights, biases, weight_dtype=jnp.bfloat16):
    """Fuse the E linear extractors into one weight slab.  Call ONCE and cache.

    weights: [E, D, F], biases: [E, 1, F] (f32)
    Returns (w_fused [Dpad, Npad] weight_dtype, b_fused [1, Npad] f32, meta).
    `weight_dtype` is a documented accuracy knob (bf16 default; f32 for exact
    parity with the PyTorch module at 2x the weight HBM traffic).
    """
    E, D, F = weights.shape
    N = E * F
    Npad = pl.cdiv(N, _LANE) * _LANE
    TK = D if D <= _TK_MAX else _TK_MAX
    Dpad = pl.cdiv(D, TK) * TK

    w = jnp.transpose(weights, (1, 0, 2)).reshape(D, N)           # [D, E*F]
    w = jnp.pad(w, ((0, Dpad - D), (0, Npad - N)))                # zero pad
    b = jnp.pad(biases.reshape(1, N).astype(jnp.float32),
                ((0, 0), (0, Npad - N)))
    meta = (E, D, F, N, Npad, TK, Dpad)
    return w.astype(weight_dtype), b, meta


@functools.partial(jax.jit, static_argnames=("meta",))
def ensemble_feature_extractor(x_nchw, w_fused, b_fused, meta):
    """x_nchw: [B, C, H, W]; pre-fused params from prepare_fused_params."""
    E, D, F, N, Npad, TK, Dpad = meta
    B = x_nchw.shape[0]

    # torch .view(B, -1) equivalent; cast fuses with the producer under jit.
    # TODO(synk): produce activations in bf16 upstream to skip this pass.
    x2d = x_nchw.reshape(B, D).astype(w_fused.dtype)
    if Dpad != D:
        x2d = jnp.pad(x2d, ((0, 0), (0, Dpad - D)))

    # Batch tiling: single step for small B, 256-row parallel tiles otherwise.
    if B <= _TM_MAX:
        TM, Bpad = B, B
    else:
        TM = _TM_MAX
        Bpad = pl.cdiv(B, TM) * TM
        if Bpad != B:
            x2d = jnp.pad(x2d, ((0, Bpad - B), (0, 0)))

    nm = Bpad // TM
    nk = Dpad // TK

    out = pl.pallas_call(
        _ensemble_fused_kernel,
        out_shape=jax.ShapeDtypeStruct((Bpad, Npad), jnp.float32),
        grid=(nm, nk),
        in_specs=[
            pl.BlockSpec((TM, TK), lambda m, k: (m, k)),      # x tile
            pl.BlockSpec((TK, Npad), lambda m, k: (k, 0)),    # fused weights
            pl.BlockSpec((1, Npad), lambda m, k: (0, 0)),     # fused bias
        ],
        out_specs=pl.BlockSpec((TM, Npad), lambda m, k: (m, 0)),
        scratch_shapes=[pltpu.VMEM((TM, Npad), jnp.float32)],
        compiler_params=pltpu.CompilerParams(
            dimension_semantics=("parallel", "arbitrary")),
    )(x2d, w_fused, b_fused)

    # Drop padding, split extractors back out, emulate .squeeze() + cat(dim=0).
    out = out[:B, :N].reshape(B, E, F)       # [B, E, F]
    out = jnp.transpose(out, (1, 0, 2))      # [E, B, F]
    if B == 1:                               # torch squeeze -> [E*F]
        return out.reshape(E * F)
    if F == 1:                               # torch squeeze -> [E*B]
        return out.reshape(E * B)
    return out.reshape(E * B, F)             # cat(dim=0) -> [E*B, F]


if __name__ == "__main__":
    # Small shapes consistent with an NCHW image input.
    B, C, H, W = 2, 4, 16, 16
    D = C * H * W          # 1024, flattened feature dim
    F = 32                 # per-extractor feature size
    E = 3                  # number of extractors in the ensemble

    key = jax.random.PRNGKey(0)
    kx, kw, kb = jax.random.split(key, 3)

    x = jax.random.normal(kx, (B, C, H, W), dtype=jnp.float32)
    weights = jax.random.normal(kw, (E, D, F), dtype=jnp.float32) * 0.02
    biases = jax.random.normal(kb, (E, 1, F), dtype=jnp.float32) * 0.1

    # Fuse / pad / cast the ensemble parameters ONCE (cached across calls).
    w_fused, b_fused, meta = prepare_fused_params(weights, biases)
    w_fused = jax.block_until_ready(w_fused)
    b_fused = jax.block_until_ready(b_fused)

    feats = ensemble_feature_extractor(x, w_fused, b_fused, meta)
    feats = jax.block_until_ready(feats)

    # Pure-JAX f32 reference (same semantics as the PyTorch ensemble forward).
    x2d = x.reshape(B, D)
    ref = jnp.concatenate(
        [jnp.squeeze(x2d @ weights[e] + biases[e]) for e in range(E)], axis=0)

    assert feats.shape == (E * B, F), feats.shape
    # bf16 inputs/weights with f32 accumulation: ~0.3% relative error vs f32.
    assert jnp.allclose(feats, ref, atol=3e-2, rtol=3e-2)

    print("KERNEL_OK")
</pallas_src>

<mosaic_0001>
module attributes {stable_mosaic.version = 11 : i64} {
  func.func @_ensemble_fused_kernel(%arg0: i32, %arg1: i32, %arg2: memref<2x1024xbf16, #tpu.memory_space<vmem>>, %arg3: memref<1024x128xbf16, #tpu.memory_space<vmem>>, %arg4: memref<1x128xf32, #tpu.memory_space<vmem>>, %arg5: memref<2x128xf32, #tpu.memory_space<vmem>>, %arg6: memref<2x128xf32, #tpu.memory_space<vmem>>) attributes {dimension_semantics = [#tpu.dimension_semantics<parallel>, #tpu.dimension_semantics<arbitrary>], iteration_bounds = array<i64: 1, 1>, scalar_prefetch = 0 : i64, scratch_operands = 1 : i64, tpu.core_type = #tpu.core_type<tc>, window_params = [{transform_indices = @transform_0, window_bounds = array<i64: 2, 1024>}, {transform_indices = @transform_1, window_bounds = array<i64: 1024, 128>}, {pipeline_mode = #tpu.pipeline_mode<synchronous>, transform_indices = @transform_2, window_bounds = array<i64: 1, 128>}, {transform_indices = @transform_3, window_bounds = array<i64: 2, 128>}]} {
    %c0_i32 = arith.constant 0 : i32
    %0 = arith.cmpi eq, %arg1, %c0_i32 : i32
    %1 = arith.extui %0 : i1 to i32
    %c0_i32_0 = arith.constant 0 : i32
    %2 = arith.cmpi ne, %1, %c0_i32_0 : i32
    scf.if %2 {
      %cst_10 = arith.constant 0.000000e+00 : f32
      %12 = vector.broadcast %cst_10 : f32 to vector<2x128xf32>
      %c0_11 = arith.constant 0 : index
      %c0_12 = arith.constant 0 : index
      %13 = vector.load %arg6[%c0_11, %c0_12] : memref<2x128xf32, #tpu.memory_space<vmem>>, vector<2x128xf32>
      tpu.vector_store %arg6[%c0_11, %c0_12], %12 {strides = array<i32>} : memref<2x128xf32, #tpu.memory_space<vmem>>, vector<2x128xf32>,
    } else {
    }
    %c0 = arith.constant 0 : index
    %c0_1 = arith.constant 0 : index
    %3 = vector.load %arg6[%c0, %c0_1] : memref<2x128xf32, #tpu.memory_space<vmem>>, vector<2x128xf32>
    %c0_2 = arith.constant 0 : index
    %c0_3 = arith.constant 0 : index
    %4 = vector.load %arg2[%c0_2, %c0_3] : memref<2x1024xbf16, #tpu.memory_space<vmem>>, vector<2x1024xbf16>
    %c0_4 = arith.constant 0 : index
    %c0_5 = arith.constant 0 : index
    %5 = vector.load %arg3[%c0_4, %c0_5] : memref<1024x128xbf16, #tpu.memory_space<vmem>>, vector<1024x128xbf16>
    %cst = arith.constant dense<0.000000e+00> : vector<2x128xf32>
    %6 = tpu.matmul %4, %5, %cst {dimension_numbers = #tpu.dot_dimension_numbers<[1], [0], [0], [1], [0, 0, 1, 1], [], []>} : vector<2x1024xbf16>, vector<1024x128xbf16>, vector<2x128xf32> -> vector<2x128xf32>
    %7 = arith.addf %3, %6 : vector<2x128xf32>
    %c0_6 = arith.constant 0 : index
    %c0_7 = arith.constant 0 : index
    %8 = vector.load %arg6[%c0_6, %c0_7] : memref<2x128xf32, #tpu.memory_space<vmem>>, vector<2x128xf32>
    tpu.vector_store %arg6[%c0_6, %c0_7], %7 {strides = array<i32>} : memref<2x128xf32, #tpu.memory_space<vmem>>, vector<2x128xf32>,
    %c0_i32_8 = arith.constant 0 : i32
    %9 = arith.cmpi eq, %arg1, %c0_i32_8 : i32
    %10 = arith.extui %9 : i1 to i32
    %c0_i32_9 = arith.constant 0 : i32
    %11 = arith.cmpi ne, %10, %c0_i32_9 : i32
    scf.if %11 {
      %c0_10 = arith.constant 0 : index
      %c0_11 = arith.constant 0 : index
      %12 = vector.load %arg6[%c0_10, %c0_11] : memref<2x128xf32, #tpu.memory_space<vmem>>, vector<2x128xf32>
      %c0_12 = arith.constant 0 : index
      %c0_13 = arith.constant 0 : index
      %13 = vector.load %arg4[%c0_12, %c0_13] : memref<1x128xf32, #tpu.memory_space<vmem>>, vector<1x128xf32>
      %14 = vector.broadcast %13 : vector<1x128xf32> to vector<2x128xf32>
      %15 = arith.addf %12, %14 : vector<2x128xf32>
      %c0_14 = arith.constant 0 : index
      %c0_15 = arith.constant 0 : index
      %16 = vector.load %arg5[%c0_14, %c0_15] : memref<2x128xf32, #tpu.memory_space<vmem>>, vector<2x128xf32>
      tpu.vector_store %arg5[%c0_14, %c0_15], %15 {strides = array<i32>} : memref<2x128xf32, #tpu.memory_space<vmem>>, vector<2x128xf32>,
    } else {
    }
    return
  }
  func.func @transform_0(%arg0: i32, %arg1: i32) -> (i32, i32) {
    %c0_i32 = arith.constant 0 : i32
    return %arg0, %arg1 : i32, i32
  }
  func.func @transform_1(%arg0: i32, %arg1: i32) -> (i32, i32) {
    %c0_i32 = arith.constant 0 : i32
    %c0_i32_0 = arith.constant 0 : i32
    return %arg1, %c0_i32 : i32, i32
  }
  func.func @transform_2(%arg0: i32, %arg1: i32) -> (i32, i32) {
    %c0_i32 = arith.constant 0 : i32
    %c0_i32_0 = arith.constant 0 : i32
    %c0_i32_1 = arith.constant 0 : i32
    return %c0_i32, %c0_i32_0 : i32, i32
  }
  func.func @transform_3(%arg0: i32, %arg1: i32) -> (i32, i32) {
    %c0_i32 = arith.constant 0 : i32
    %c0_i32_0 = arith.constant 0 : i32
    return %arg0, %c0_i32 : i32, i32
  }
}

</mosaic_0001>

<bundles_post_ra>
// kernel: ensemble_feature_extractor.1
= control target key start
LH: loop header
LB: loop body
LE: loop exit
PB: predicated region body
PF: predicated region fallthrough
CT: control target
= control target key end

     0   :  { %8 = vsyncpa [#allocation4], 0  ;;  %s1039_s15 = smov [#allocation3]   ;;  %s1040_s17 = smov 64   ;;  %s1075_s0 = inlined_call_operand.vmem [shape: bf16[2,1024], index: 0, kind: input, shape index: {}]   ;;  %s1076_s1 = inlined_call_operand.hbm [shape: bf16[1024,128], index: 1, kind: input, shape index: {}]   ;;  %s1077_s2 = inlined_call_operand.vmem [shape: f32[1,128], index: 2, kind: input, shape index: {}]   ;;  %s1078_s3 = inlined_call_operand.vmem [shape: f32[2,128], index: 3, kind: output, shape index: {}]  }
   0x1   :  { %s15_s14 = sshll.u32 %s1076_s1, 4  ;;  %s17_s16 = sshll.u32 %s1039_s15, 4  ;;  %s16_s14 = int_to_ptr.hbm [resolvable:$true] %s15_s14  ;;  %s18_s16 = int_to_ptr.vmem [resolvable:$true] %s17_s16 }
   0x2   :  { %s1041_s18 = smov 4  }
   0x3   :  { %23 = dma.hbm_to_vmem [thread:$0]  %s16_s14, 8192, %s18_s16, [#allocation4], %s1040_s17, %s1040_s17, %s1041_s18  }
   0x4   :  { %1037 = dma.done.wait [#allocation4], 8192  }
   0x5   :  { %1038 = vsyncadd [#allocation4], 4294959104  ;;  %v951_v0 = vld [vmem:[#allocation3 + $0x38] sm:$0xff]  ;;  %v950_v4 = vld [vmem:[#allocation3 + $0x30] sm:$0xff] }
   0x6   :  { %v959_v1 = vld [vmem:[#allocation3 + $0x78] sm:$0xff]  ;;  %567 = vmatpush.bf16.msra.mxu0 %v951_v0  ;;  %v958_v5 = vld [vmem:[#allocation3 + $0x70] sm:$0xff]  ;;  %v949_v8 = vld [vmem:[#allocation3 + $0x28] sm:$0xff] }
   0x7   :  { %v967_v2 = vld [vmem:[#allocation3 + $0xb8] sm:$0xff]  ;;  %580 = vmatpush.bf16.msra.mxu1 %v959_v1  ;;  %v966_v6 = vld [vmem:[#allocation3 + $0xb0] sm:$0xff]  ;;  %v957_v9 = vld [vmem:[#allocation3 + $0x68] sm:$0xff] }
   0x8   :  { %v975_v3 = vld [vmem:[#allocation3 + $0xf8] sm:$0xff]  ;;  %593 = vmatpush.bf16.msra.mxu2 %v967_v2  ;;  %v974_v7 = vld [vmem:[#allocation3 + $0xf0] sm:$0xff]  ;;  %v965_v10 = vld [vmem:[#allocation3 + $0xa8] sm:$0xff] }
   0x9   :  { %606 = vmatpush.bf16.msra.mxu3 %v975_v3  ;;  %v973_v11 = vld [vmem:[#allocation3 + $0xe8] sm:$0xff]  ;;  %v948_v12 = vld [vmem:[#allocation3 + $0x20] sm:$0xff]  ;;  %v36_v16 = vld [vmem:[%s1075_s0] sm:$0xff] }
   0xa   :  { %568 = vmatpush.bf16.msra.mxu0 %v950_v4  ;;  %v956_v13 = vld [vmem:[#allocation3 + $0x60] sm:$0xff]  ;;  %v947_v17 = vld [vmem:[#allocation3 + $0x18] sm:$0xff]  ;;  %166 = vst [vmem:[#allocation1] ss:$9 sm:$0xff] %v36_v16  ;;  %v946_v21 = vld [vmem:[#allocation3 + $0x10] sm:$0xff] }
   0xb   :  { %581 = vmatpush.bf16.msra.mxu1 %v958_v5  ;;  %v964_v14 = vld [vmem:[#allocation3 + $0xa0] sm:$0xff]  ;;  %v955_v18 = vld [vmem:[#allocation3 + $0x58] sm:$0xff]  ;;  %v954_v22 = vld [vmem:[#allocation3 + $0x50] sm:$0xff] }
   0xc   :  { %594 = vmatpush.bf16.msra.mxu2 %v966_v6  ;;  %v972_v15 = vld [vmem:[#allocation3 + $0xe0] sm:$0xff]  ;;  %v963_v19 = vld [vmem:[#allocation3 + $0x98] sm:$0xff]  ;;  %v962_v23 = vld [vmem:[#allocation3 + $0x90] sm:$0xff] }
   0xd   :  { %607 = vmatpush.bf16.msra.mxu3 %v974_v7  ;;  %v971_v20 = vld [vmem:[#allocation3 + $0xd8] sm:$0xff]  ;;  %v970_v24 = vld [vmem:[#allocation3 + $0xd0] sm:$0xff]  ;;  %v945_v25 = vld [vmem:[#allocation3 + $0x8] sm:$0xff] }
   0xe   :  { %569 = vmatpush.bf16.msra.mxu0 %v949_v8  ;;  %v953_v26 = vld [vmem:[#allocation3 + $0x48] sm:$0xff]  ;;  %v944_v29 = vld [vmem:[#allocation3] sm:$0xff]  ;;  %v983_v33 = vld [vmem:[#allocation3 + $0x138] sm:$0xff] }
   0xf   :  { %582 = vmatpush.bf16.msra.mxu1 %v957_v9  ;;  %v961_v27 = vld [vmem:[#allocation3 + $0x88] sm:$0xff]  ;;  %v952_v30 = vld [vmem:[#allocation3 + $0x40] sm:$0xff]  ;;  %v991_v34 = vld [vmem:[#allocation3 + $0x178] sm:$0xff] }
  0x10   :  { %595 = vmatpush.bf16.msra.mxu2 %v965_v10  ;;  %v969_v28 = vld [vmem:[#allocation3 + $0xc8] sm:$0xff]  ;;  %v960_v31 = vld [vmem:[#allocation3 + $0x80] sm:$0xff]  ;;  %v999_v35 = vld [vmem:[#allocation3 + $0x1b8] sm:$0xff] }
  0x11   :  { %608 = vmatpush.bf16.msra.mxu3 %v973_v11  ;;  %v968_v32 = vld [vmem:[#allocation3 + $0xc0] sm:$0xff]  ;;  %v1007_v36 = vld [vmem:[#allocation3 + $0x1f8] sm:$0xff]  ;;  %v982_v37 = vld [vmem:[#allocation3 + $0x130] sm:$0xff]  ;;  %v1042_v11 = vmov 0.0  }
  0x12   :  { %570 = vmatpush.bf16.msra.mxu0 %v948_v12  ;;  %v169_v38 = vld [vmem:[#allocation1 + $0x12] sm:$0xff]  ;;  %v167_v39 = vld [vmem:[#allocation1] sm:$0xff]  ;;  %v168_v42 = vld [vmem:[#allocation1 + $0x9] sm:$0xff]  ;;  %34 = vst [vmem:[#allocation2] sm:$0x3] %v1042_v11 }
  0x13   :  { %583 = vmatpush.bf16.msra.mxu1 %v956_v13  ;;  %v990_v40 = vld [vmem:[#allocation3 + $0x170] sm:$0xff]  ;;  %v981_v45 = vld [vmem:[#allocation3 + $0x128] sm:$0xff]  ;;  %v980_v49 = vld [vmem:[#allocation3 + $0x120] sm:$0xff] }
  0x14   :  { %596 = vmatpush.bf16.msra.mxu2 %v964_v14  ;;  %v170_v41 = vld [vmem:[#allocation1 + $0x1b] sm:$0xff]  ;;  %v989_v46 = vld [vmem:[#allocation3 + $0x168] sm:$0xff]  ;;  %v988_v50 = vld [vmem:[#allocation3 + $0x160] sm:$0xff] }
  0x15   :  { %609 = vmatpush.bf16.msra.mxu3 %v972_v15  ;;  %v998_v43 = vld [vmem:[#allocation3 + $0x1b0] sm:$0xff]  ;;  %v997_v47 = vld [vmem:[#allocation3 + $0x1a8] sm:$0xff]  ;;  %v996_v51 = vld [vmem:[#allocation3 + $0x1a0] sm:$0xff] }
  0x16   :  { %571 = vmatpush.bf16.msra.mxu0 %v947_v17  ;;  %v1006_v44 = vld [vmem:[#allocation3 + $0x1f0] sm:$0xff]  ;;  %v1005_v48 = vld [vmem:[#allocation3 + $0x1e8] sm:$0xff]  ;;  %v1004_v52 = vld [vmem:[#allocation3 + $0x1e0] sm:$0xff] }
  0x17   :  { %584 = vmatpush.bf16.msra.mxu1 %v955_v18  ;;  %v979_v53 = vld [vmem:[#allocation3 + $0x118] sm:$0xff]  ;;  %v978_v57 = vld [vmem:[#allocation3 + $0x110] sm:$0xff]  ;;  %v977_v61 = vld [vmem:[#allocation3 + $0x108] sm:$0xff] }
  0x18   :  { %597 = vmatpush.bf16.msra.mxu2 %v963_v19  ;;  %v987_v54 = vld [vmem:[#allocation3 + $0x158] sm:$0xff]  ;;  %v986_v58 = vld [vmem:[#allocation3 + $0x150] sm:$0xff]  ;;  %v985_v62 = vld [vmem:[#allocation3 + $0x148] sm:$0xff] }
  0x19   :  { %610 = vmatpush.bf16.msra.mxu3 %v971_v20  ;;  %v995_v55 = vld [vmem:[#allocation3 + $0x198] sm:$0xff]  ;;  %v994_v59 = vld [vmem:[#allocation3 + $0x190] sm:$0xff]  ;;  %v993_v63 = vld [vmem:[#allocation3 + $0x188] sm:$0xff] }
  0x1a   :  { %572 = vmatpush.bf16.msra.mxu0 %v946_v21  ;;  %v1003_v56 = vld [vmem:[#allocation3 + $0x1d8] sm:$0xff]  ;;  %v1002_v60 = vld [vmem:[#allocation3 + $0x1d0] sm:$0xff]  ;;  %v1001_v0 = vld [vmem:[#allocation3 + $0x1c8] sm:$0xff] }
  0x1b   :  { %585 = vmatpush.bf16.msra.mxu1 %v954_v22  ;;  %v976_v1 = vld [vmem:[#allocation3 + $0x100] sm:$0xff]  ;;  %v173_v7 = vld [vmem:[#allocation1 + $0x36] sm:$0xff]  ;;  %v174_v8 = vld [vmem:[#allocation1 + $0x3f] sm:$0xff] }
  0x1c   :  { %598 = vmatpush.bf16.msra.mxu2 %v962_v23  ;;  %v984_v2 = vld [vmem:[#allocation3 + $0x140] sm:$0xff] }
  0x1d   :  { %611 = vmatpush.bf16.msra.mxu3 %v970_v24  ;;  %v992_v3 = vld [vmem:[#allocation3 + $0x180] sm:$0xff] }
  0x1e   :  { %573 = vmatpush.bf16.msra.mxu0 %v945_v25  ;;  %v1000_v4 = vld [vmem:[#allocation3 + $0x1c0] sm:$0xff] }
  0x1f   :  { %586 = vmatpush.bf16.msra.mxu1 %v953_v26  ;;  %v171_v5 = vld [vmem:[#allocation1 + $0x24] sm:$0xff]  ;;  %v172_v6 = vld [vmem:[#allocation1 + $0x2d] sm:$0xff] }
  0x20   :  { %599 = vmatpush.bf16.msra.mxu2 %v961_v27 }
  0x21   :  { %612 = vmatpush.bf16.msra.mxu3 %v969_v28 }
  0x22   :  { %574 = vmatpush.bf16.msra.mxu0 %v944_v29 }
  0x23   :  { %587 = vmatpush.bf16.msra.mxu1 %v952_v30  ;;  %v35_v30 = vld [vmem:[#allocation2] sm:$0x3] }
  0x24   :  { %600 = vmatpush.bf16.msra.mxu2 %v960_v31 }
  0x25   :  { %613 = vmatpush.bf16.msra.mxu3 %v968_v32  ;;  %575 = vmatmul.bf16.vlgmr.msra.gmra.mxu0 %v167_v39 }
  0x26   :  { %619 = vmatpush.bf16.msrb.mxu0 %v983_v33  ;;  %588 = vmatmul.bf16.vlgmr.msra.gmra.mxu1 %v168_v42 }
  0x27   :  { %632 = vmatpush.bf16.msrb.mxu1 %v991_v34  ;;  %601 = vmatmul.bf16.vlgmr.msra.gmra.mxu2 %v169_v38 }
  0x28   :  { %645 = vmatpush.bf16.msrb.mxu2 %v999_v35  ;;  %614 = vmatmul.bf16.vlgmr.msra.gmra.mxu3 %v170_v41  ;;  %v1012_v35 = vld [vmem:[%s1077_s2] ss:$0 sm:$0xff] }
  0x29   :  { %658 = vmatpush.bf16.msrb.mxu3 %v1007_v36 }
  0x2a   :  { %620 = vmatpush.bf16.msrb.mxu0 %v982_v37 }
  0x2b   :  { %633 = vmatpush.bf16.msrb.mxu1 %v990_v40 }
  0x2c   :  { %646 = vmatpush.bf16.msrb.mxu2 %v998_v43 }
  0x2d   :  { %659 = vmatpush.bf16.msrb.mxu3 %v1006_v44 }
  0x2e   :  { %621 = vmatpush.bf16.msrb.mxu0 %v981_v45 }
  0x2f   :  { %634 = vmatpush.bf16.msrb.mxu1 %v989_v46 }
  0x30   :  { %647 = vmatpush.bf16.msrb.mxu2 %v997_v47 }
  0x31   :  { %660 = vmatpush.bf16.msrb.mxu3 %v1005_v48 }
  0x32   :  { %622 = vmatpush.bf16.msrb.mxu0 %v980_v49 }
  0x33   :  { %635 = vmatpush.bf16.msrb.mxu1 %v988_v50 }
  0x34   :  { %648 = vmatpush.bf16.msrb.mxu2 %v996_v51 }
  0x35   :  { %661 = vmatpush.bf16.msrb.mxu3 %v1004_v52 }
  0x36   :  { %623 = vmatpush.bf16.msrb.mxu0 %v979_v53 }
  0x37   :  { %636 = vmatpush.bf16.msrb.mxu1 %v987_v54 }
  0x38   :  { %649 = vmatpush.bf16.msrb.mxu2 %v995_v55 }
  0x39   :  { %662 = vmatpush.bf16.msrb.mxu3 %v1003_v56 }
  0x3a   :  { %624 = vmatpush.bf16.msrb.mxu0 %v978_v57 }
  0x3b   :  { %637 = vmatpush.bf16.msrb.mxu1 %v986_v58 }
  0x3c   :  { %650 = vmatpush.bf16.msrb.mxu2 %v994_v59 }
  0x3d   :  { %663 = vmatpush.bf16.msrb.mxu3 %v1002_v60 }
  0x3e   :  { %625 = vmatpush.bf16.msrb.mxu0 %v977_v61 }
  0x3f   :  { %638 = vmatpush.bf16.msrb.mxu1 %v985_v62 }
  0x40   :  { %651 = vmatpush.bf16.msrb.mxu2 %v993_v63 }
  0x41   :  { %664 = vmatpush.bf16.msrb.mxu3 %v1001_v0 }
  0x42   :  { %626 = vmatpush.bf16.msrb.mxu0 %v976_v1 }
  0x43   :  { %639 = vmatpush.bf16.msrb.mxu1 %v984_v2 }
  0x44   :  { %652 = vmatpush.bf16.msrb.mxu2 %v992_v3 }
  0x45   :  { %665 = vmatpush.bf16.msrb.mxu3 %v1000_v4  ;;  %627 = vmatmul.bf16.vlgmr.msrb.gmra.mxu0 %v171_v5 }
  0x46   :  { %640 = vmatmul.bf16.vlgmr.msrb.gmra.mxu1 %v172_v6 }
  0x47   :  { %653 = vmatmul.bf16.vlgmr.msrb.gmra.mxu2 %v173_v7 }
  0x48   :  { %666 = vmatmul.bf16.vlgmr.msrb.gmra.mxu3 %v174_v8 }
  0xa2   :  { %v576_v9 = vpop.f32.mrf.mxu0 }
  0xa3   :  { %v589_v10 = vpop.f32.mrf.mxu1 }
  0xa4   :  { %v590_v18 = vadd.f32 %v589_v10, %v576_v9 }
  0xaa   :  { %v602_v12 = vpop.f32.mrf.mxu2  ;;  %v578_v14 = vpop.f32.mrf.mxu0 }
  0xab   :  { %v615_v13 = vpop.f32.mrf.mxu3  ;;  %v591_v15 = vpop.f32.mrf.mxu1  ;;  %v603_v19 = vadd.f32 %v602_v12, %v590_v18 }
  0xad   :  { %v616_v20 = vadd.f32 %v615_v13, %v603_v19 }
  0xb2   :  { %v604_v16 = vpop.f32.mrf.mxu2 }
  0xb3   :  { %v617_v17 = vpop.f32.mrf.mxu3 }
  0xc2   :  { %v628_v21 = vpop.f32.mrf.mxu0 }
  0xc3   :  { %v641_v22 = vpop.f32.mrf.mxu1  ;;  %v629_v23 = vadd.f32 %v628_v21, %v616_v20 }
  0xc5   :  { %v642_v24 = vadd.f32 %v641_v22, %v629_v23 }
  0xca   :  { %v654_v25 = vpop.f32.mrf.mxu2  ;;  %v630_v28 = vpop.f32.mrf.mxu0 }
  0xcb   :  { %v667_v26 = vpop.f32.mrf.mxu3  ;;  %v655_v27 = vadd.f32 %v654_v25, %v642_v24  ;;  %v643_v29 = vpop.f32.mrf.mxu1 }
  0xcd   :  { %v668_v31 = vadd.f32 %v667_v26, %v655_v27 }
  0xcf   :  { %v671_v32 = vadd.f32 %v668_v31, %v35_v30 }
  0xd1   :  { %672 = vst [vmem:[#allocation2] sm:$0x3] %v671_v32 }
  0xd2   :  { %v656_v33 = vpop.f32.mrf.mxu2 }
  0xd3   :  { %v669_v34 = vpop.f32.mrf.mxu3 }
  0xd8   :  { %v676_v36 = vld [vmem:[#allocation2] sm:$0x3] }
  0xd9   :  { %v681_v37 = vadd.f32 %v1012_v35, %v676_v36 }
  0xdb   :  { %682 = vst [vmem:[%s1078_s3] sm:$0x3] %v681_v37 }
  0xdc   :  { %687 = vsyncpa [#allocation4], 1 }

</bundles_post_ra>
